<compile_context>
chip_gen: v7x
topology: tpu7x:2x2x1
jax: 0.10.0
libtpu: 0.0.40
codegen_flags: <defaults>
</compile_context>

<pallas_src>
import jax
import jax.numpy as jnp
from jax.experimental import pallas as pl
from jax.experimental.pallas import tpu as pltpu

C_CONV = 8            # Conv2d(1, 8, 3, padding=1)
KH = KW = 3
K_AUG = KH * KW + 3   # 9 conv taps + 2 mesh-grid coord channels + 1 bias row
D_POINTNET = 64       # Conv1d(10, 64, 1)
N_CLASSES = 10        # Linear(64, 10)


# --------------------------- fused Pallas kernel -----------------------------

def _tcnn_fused_kernel(patches_ref, w_ref, fcw_ref, fcb_ref, out_ref):
    # patches_ref: (1, n_grp, K_AUG, SG*bc) bf16  (spatial-group major, image on lanes)
    # w_ref:       (64, K_AUG) bf16   -- conv folded into pointNet + coord/bias cols
    # fcw_ref:     (10, 64) f32       fcb_ref: (10, 1) f32
    # out_ref:     (10, bc)  f32      -- lane-dense logits block for this chunk
    n_grp = patches_ref.shape[1]
    bc = out_ref.shape[1]
    sg = patches_ref.shape[3] // bc

    w = w_ref[...]                                                    # (64, K_AUG)

    def body(grp, m):
        seg = patches_ref[0, grp]                                     # (K_AUG, sg*bc)
        scores = jnp.dot(w, seg, preferred_element_type=jnp.float32)  # (64, sg*bc) f32
        for i in range(sg):                                           # small static unroll
            m = jnp.maximum(m, scores[:, i * bc:(i + 1) * bc])        # running per-image max
        return m

    feat = jax.lax.fori_loop(
        0, n_grp, body,
        jnp.full((D_POINTNET, bc), -jnp.inf, dtype=jnp.float32))      # (64, bc)

    out_ref[...] = (jnp.dot(fcw_ref[...], feat,
                            preferred_element_type=jnp.float32)
                    + fcb_ref[...])                                   # (10, bc)


# --------------------------- wrapper / glue ----------------------------------

def gen_mesh_grid(h, w):
    xs = jnp.linspace(-1.0, 1.0, w)
    ys = jnp.linspace(-1.0, 1.0, h)
    gx, gy = jnp.meshgrid(xs, ys, indexing="xy")    # each (h, w)
    return jnp.stack([gx, gy], axis=0)              # (2, h, w)


def init_params(key):
    k = jax.random.split(key, 6)
    return dict(
        conv_w=0.30 * jax.random.normal(k[0], (C_CONV, 1, KH, KW), jnp.float32),
        conv_b=0.10 * jax.random.normal(k[1], (C_CONV,), jnp.float32),
        pn_w=0.20 * jax.random.normal(k[2], (D_POINTNET, 2 + C_CONV, 1), jnp.float32),
        pn_b=0.10 * jax.random.normal(k[3], (D_POINTNET,), jnp.float32),
        fc_w=0.10 * jax.random.normal(k[4], (N_CLASSES, D_POINTNET), jnp.float32),
        fc_b=0.10 * jax.random.normal(k[5], (N_CLASSES,), jnp.float32),
    )


def _pick_batch_chunk(B):
    # The (10, bc) output block must be legal: either bc == padded batch
    # (block == full array) or a multiple of 128 (lane-dense). bc = 128 keeps
    # per-step VMEM at ~2-3 MiB (well under v5e's 16 MiB scoped default, so no
    # explicit vmem_limit_bytes needed) and yields >= 2 "parallel" grid steps
    # (both v7x TensorCores) for B > 128.
    return B if B <= 128 else 128


def _pick_spatial_group(hw):
    # Spatial positions per inner matmul. 4 keeps the (64, sg*bc) f32 scores
    # value within the vreg budget for bc = 128 while amortizing MXU issues.
    for sg in (4, 2, 1):
        if hw % sg == 0:
            return sg
    return 1


def tcnn_forward(x, params, *, batch_chunk=None):
    B, cin, H, W = x.shape
    assert cin == 1
    x = x.astype(jnp.float32)
    HW = H * W

    bc = batch_chunk or _pick_batch_chunk(B)
    nchunks = pl.cdiv(B, bc)
    B_pad = nchunks * bc
    assert bc == B_pad or bc % 128 == 0, (B, bc)
    sg = _pick_spatial_group(HW)
    n_grp = HW // sg

    # ---- layout glue (plain JAX, once per call) ----
    # Augmented im2col: 9 conv taps + 2 coord channels + a ones row, so the
    # whole conv/concat/pointNet stack is a single matmul against w_aug below.
    xpad = jnp.pad(x[:, 0], ((0, 0), (1, 1), (1, 1)))              # (B, H+2, W+2)
    taps = jnp.stack(
        [xpad[:, dy:dy + H, dx:dx + W].reshape(B, HW)
         for dy in range(KH) for dx in range(KW)], axis=0)         # (9, B, HW)
    coords = gen_mesh_grid(H, W).reshape(2, HW)                    # (2, HW)
    coords_b = jnp.broadcast_to(coords[:, None, :], (2, B, HW))
    ones_b = jnp.ones((1, B, HW), jnp.float32)
    aug = jnp.concatenate([taps, coords_b, ones_b], axis=0)        # (12, B, HW)
    if B_pad != B:
        aug = jnp.pad(aug, ((0, 0), (0, B_pad - B), (0, 0)))       # zero-pad batch
    # -> (nchunks, n_grp, K_AUG, sg*bc): spatial-group major, image index on lanes.
    patches = (aug.reshape(K_AUG, nchunks, bc, n_grp, sg)
               .transpose(1, 3, 0, 4, 2)
               .reshape(nchunks, n_grp, K_AUG, sg * bc)
               .astype(jnp.bfloat16))

    # Folded weights: w_aug = [pn_w_conv @ conv_w | pn_w_xy | pn_w_conv@conv_b + pn_b]
    pn_w = params["pn_w"][:, :, 0]                                 # (64, 10)
    pn_w_xy, pn_w_conv = pn_w[:, :2], pn_w[:, 2:]                  # (64,2), (64,8)
    conv_w = params["conv_w"].reshape(C_CONV, KH * KW)             # (8, 9)
    w_comb = pn_w_conv @ conv_w                                    # (64, 9)
    bias_col = (pn_w_conv @ params["conv_b"].reshape(C_CONV, 1)
                + params["pn_b"].reshape(D_POINTNET, 1))           # (64, 1)
    w_aug = jnp.concatenate([w_comb, pn_w_xy, bias_col],
                            axis=1).astype(jnp.bfloat16)           # (64, 12)
    fc_w = params["fc_w"].astype(jnp.float32)                      # (10, 64)
    fc_b = params["fc_b"].reshape(N_CLASSES, 1).astype(jnp.float32)

    # TODO(synk): `seeds = self.ap1(self.pool(x))` in the reference forward is
    # dead code (result unused; its expand/permute also errors on 4-D input in
    # PyTorch) and `feat2coords` is never called -> both omitted here.
    # TODO(synk): for much larger images/batches, synthesize the 9 conv taps
    # in-kernel from the padded image via pltpu.roll instead of materializing
    # the 12x-expanded patch array in HBM (roofline lever per review item 10).

    out = pl.pallas_call(
        _tcnn_fused_kernel,
        out_shape=jax.ShapeDtypeStruct((N_CLASSES, B_pad), jnp.float32),
        grid=(nchunks,),
        in_specs=[
            pl.BlockSpec((1, n_grp, K_AUG, sg * bc), lambda g: (g, 0, 0, 0)),
            pl.BlockSpec((D_POINTNET, K_AUG), lambda g: (0, 0)),
            pl.BlockSpec((N_CLASSES, D_POINTNET), lambda g: (0, 0)),
            pl.BlockSpec((N_CLASSES, 1), lambda g: (0, 0)),
        ],
        out_specs=pl.BlockSpec((N_CLASSES, bc), lambda g: (0, g)),
        compiler_params=pltpu.CompilerParams(
            dimension_semantics=("parallel",)),
    )(patches, w_aug, fc_w, fc_b)

    return out[:, :B].T                                            # (B, 10)


def tcnn_reference(x, params):
    """Pure-JAX f32 reference mirroring the PyTorch forward (for validation)."""
    B, _, H, W = x.shape
    xp = jnp.pad(x[:, 0].astype(jnp.float32), ((0, 0), (1, 1), (1, 1)))
    conv_w, conv_b = params["conv_w"], params["conv_b"]
    chans = []
    for c in range(C_CONV):
        acc = jnp.zeros((B, H, W), jnp.float32)
        for dy in range(KH):
            for dx in range(KW):
                acc = acc + conv_w[c, 0, dy, dx] * xp[:, dy:dy + H, dx:dx + W]
        chans.append(acc + conv_b[c])
    conv = jnp.stack(chans, axis=1)                                # (B, 8, H, W)
    coords = gen_mesh_grid(H, W)
    full = jnp.concatenate(
        [jnp.broadcast_to(coords[None], (B, 2, H, W)), conv], axis=1)
    pts = full.reshape(B, 2 + C_CONV, H * W)                       # (B, 10, HW)
    points = jnp.einsum("oc,bcs->bos", params["pn_w"][:, :, 0], pts,
                        preferred_element_type=jnp.float32)
    points = points + params["pn_b"][None, :, None]
    feat = jnp.max(points, axis=2)                                 # (B, 64)
    return feat @ params["fc_w"].T + params["fc_b"]


if __name__ == "__main__":
    key = jax.random.PRNGKey(0)
    k_param, k_x1, k_x2 = jax.random.split(key, 3)
    params = init_params(k_param)

    # Small canonical case (single grid step, block == full array).
    x = jax.random.normal(k_x1, (2, 1, 16, 16), jnp.float32)
    out = jax.block_until_ready(tcnn_forward(x, params))
    assert out.shape == (2, N_CLASSES), out.shape
    err = float(jnp.max(jnp.abs(out - tcnn_reference(x, params))))
    # bf16 patches / folded weights with f32 accumulation -> bf16-appropriate tol.
    assert err < 3e-2, f"max abs error vs reference (B=2): {err}"

    # Larger, non-dividing batch: exercises bc=128 lane-dense output blocks,
    # the multi-step "parallel" grid and the batch-padding path.
    xl = jax.random.normal(k_x2, (130, 1, 16, 16), jnp.float32)
    outl = jax.block_until_ready(tcnn_forward(xl, params))
    assert outl.shape == (130, N_CLASSES), outl.shape
    errl = float(jnp.max(jnp.abs(outl - tcnn_reference(xl, params))))
    assert errl < 3e-2, f"max abs error vs reference (B=130): {errl}"

    print("KERNEL_OK")
</pallas_src>

<mosaic_0001>
module attributes {stable_mosaic.version = 11 : i64} {
  func.func @_tcnn_fused_kernel(%arg0: i32, %arg1: memref<1x64x12x8xbf16, #tpu.memory_space<vmem>>, %arg2: memref<64x12xbf16, #tpu.memory_space<vmem>>, %arg3: memref<10x64xf32, #tpu.memory_space<vmem>>, %arg4: memref<10x1xf32, #tpu.memory_space<vmem>>, %arg5: memref<10x2xf32, #tpu.memory_space<vmem>>) attributes {dimension_semantics = [#tpu.dimension_semantics<parallel>], iteration_bounds = array<i64: 1>, scalar_prefetch = 0 : i64, scratch_operands = 0 : i64, tpu.core_type = #tpu.core_type<tc>, window_params = [{transform_indices = @transform_0, window_bounds = array<i64: 1, 64, 12, 8>}, {pipeline_mode = #tpu.pipeline_mode<synchronous>, transform_indices = @transform_1, window_bounds = array<i64: 64, 12>}, {pipeline_mode = #tpu.pipeline_mode<synchronous>, transform_indices = @transform_2, window_bounds = array<i64: 10, 64>}, {pipeline_mode = #tpu.pipeline_mode<synchronous>, transform_indices = @transform_3, window_bounds = array<i64: 10, 1>}, {transform_indices = @transform_4, window_bounds = array<i64: 10, 2>}]} {
    %c0 = arith.constant 0 : index
    %c0_0 = arith.constant 0 : index
    %0 = vector.load %arg2[%c0, %c0_0] : memref<64x12xbf16, #tpu.memory_space<vmem>>, vector<64x12xbf16>
    %cst = arith.constant 0xFF800000 : f32
    %1 = vector.broadcast %cst : f32 to vector<64x2xf32>
    %c0_i32 = arith.constant 0 : i32
    %c64_i32 = arith.constant 64 : i32
    %2 = arith.addi %c0_i32, %c64_i32 : i32
    %c1_i32 = arith.constant 1 : i32
    %3 = scf.for %arg6 = %c0_i32 to %2 step %c1_i32 iter_args(%arg7 = %1) -> (vector<64x2xf32>)  : i32 {
      %c0_9 = arith.constant 0 : index
      %10 = arith.index_cast %arg6 : i32 to index
      %c0_10 = arith.constant 0 : index
      %c0_11 = arith.constant 0 : index
      %11 = vector.load %arg1[%c0_9, %10, %c0_10, %c0_11] : memref<1x64x12x8xbf16, #tpu.memory_space<vmem>>, vector<1x1x12x8xbf16>
      %12 = vector.shape_cast %11 : vector<1x1x12x8xbf16> to vector<12x8xbf16>
      %cst_12 = arith.constant dense<0.000000e+00> : vector<64x8xf32>
      %13 = tpu.matmul %0, %12, %cst_12 {dimension_numbers = #tpu.dot_dimension_numbers<[1], [0], [0], [1], [0, 0, 1, 1], [], []>} : vector<64x12xbf16>, vector<12x8xbf16>, vector<64x8xf32> -> vector<64x8xf32>
      %14 = vector.extract_strided_slice %13 {offsets = [0, 0], sizes = [64, 2], strides = [1, 1]} : vector<64x8xf32> to vector<64x2xf32>
      %15 = arith.maximumf %arg7, %14 : vector<64x2xf32>
      %16 = vector.extract_strided_slice %13 {offsets = [0, 2], sizes = [64, 2], strides = [1, 1]} : vector<64x8xf32> to vector<64x2xf32>
      %17 = arith.maximumf %15, %16 : vector<64x2xf32>
      %18 = vector.extract_strided_slice %13 {offsets = [0, 4], sizes = [64, 2], strides = [1, 1]} : vector<64x8xf32> to vector<64x2xf32>
      %19 = arith.maximumf %17, %18 : vector<64x2xf32>
      %20 = vector.extract_strided_slice %13 {offsets = [0, 6], sizes = [64, 2], strides = [1, 1]} : vector<64x8xf32> to vector<64x2xf32>
      %21 = arith.maximumf %19, %20 : vector<64x2xf32>
      scf.yield %21 : vector<64x2xf32>
    }
    %c64_i32_1 = arith.constant 64 : i32
    %c0_2 = arith.constant 0 : index
    %c0_3 = arith.constant 0 : index
    %4 = vector.load %arg3[%c0_2, %c0_3] : memref<10x64xf32, #tpu.memory_space<vmem>>, vector<10x64xf32>
    %cst_4 = arith.constant dense<0.000000e+00> : vector<10x2xf32>
    %5 = tpu.matmul %4, %3, %cst_4 {dimension_numbers = #tpu.dot_dimension_numbers<[1], [0], [0], [1], [0, 0, 1, 1], [], []>} : vector<10x64xf32>, vector<64x2xf32>, vector<10x2xf32> -> vector<10x2xf32>
    %c0_5 = arith.constant 0 : index
    %c0_6 = arith.constant 0 : index
    %6 = vector.load %arg4[%c0_5, %c0_6] : memref<10x1xf32, #tpu.memory_space<vmem>>, vector<10x1xf32>
    %7 = vector.broadcast %6 : vector<10x1xf32> to vector<10x2xf32>
    %8 = arith.addf %5, %7 : vector<10x2xf32>
    %c0_7 = arith.constant 0 : index
    %c0_8 = arith.constant 0 : index
    %9 = vector.load %arg5[%c0_7, %c0_8] : memref<10x2xf32, #tpu.memory_space<vmem>>, vector<10x2xf32>
    tpu.vector_store %arg5[%c0_7, %c0_8], %8 {strides = array<i32>} : memref<10x2xf32, #tpu.memory_space<vmem>>, vector<10x2xf32>,
    return
  }
  func.func @transform_0(%arg0: i32) -> (i32, i32, i32, i32) {
    %c0_i32 = arith.constant 0 : i32
    %c0_i32_0 = arith.constant 0 : i32
    %c0_i32_1 = arith.constant 0 : i32
    %c0_i32_2 = arith.constant 0 : i32
    return %arg0, %c0_i32, %c0_i32_0, %c0_i32_1 : i32, i32, i32, i32
  }
  func.func @transform_1(%arg0: i32) -> (i32, i32) {
    %c0_i32 = arith.constant 0 : i32
    %c0_i32_0 = arith.constant 0 : i32
    %c0_i32_1 = arith.constant 0 : i32
    return %c0_i32, %c0_i32_0 : i32, i32
  }
  func.func @transform_2(%arg0: i32) -> (i32, i32) {
    %c0_i32 = arith.constant 0 : i32
    %c0_i32_0 = arith.constant 0 : i32
    %c0_i32_1 = arith.constant 0 : i32
    return %c0_i32, %c0_i32_0 : i32, i32
  }
  func.func @transform_3(%arg0: i32) -> (i32, i32) {
    %c0_i32 = arith.constant 0 : i32
    %c0_i32_0 = arith.constant 0 : i32
    %c0_i32_1 = arith.constant 0 : i32
    return %c0_i32, %c0_i32_0 : i32, i32
  }
  func.func @transform_4(%arg0: i32) -> (i32, i32) {
    %c0_i32 = arith.constant 0 : i32
    %c0_i32_0 = arith.constant 0 : i32
    return %c0_i32, %arg0 : i32, i32
  }
}

</mosaic_0001>

<bundles_post_ra>
// kernel: tpu_custom_call.1
= control target key start
LH: loop header
LB: loop body
LE: loop exit
PB: predicated region body
PF: predicated region fallthrough
CT: control target
= control target key end

     0   :  { %v696_v8 = vmov -inf   ;;  %v698_v9 = vmov -inf   ;;  %v700_v10 = vmov -inf   ;;  %v702_v11 = vmov -inf   ;;  %s712_s5 = smov 0   ;;  %s830_s0 = inlined_call_operand.vmem [shape: bf16[1,64,12,8], index: 0, kind: input, shape index: {}]   ;;  %s831_s1 = inlined_call_operand.vmem [shape: bf16[64,12], index: 1, kind: input, shape index: {}]   ;;  %s832_s2 = inlined_call_operand.vmem [shape: f32[10,64], index: 2, kind: input, shape index: {}]   ;;  %s833_s3 = inlined_call_operand.vmem [shape: f32[10,1], index: 3, kind: input, shape index: {}]   ;;  %s834_s4 = inlined_call_operand.vmem [shape: f32[10,2], index: 4, kind: output, shape index: {}]  }
   0x1   :  { %v659_v0 = vld [vmem:[%s831_s1] sm:$0xf]  ;;  %v664_v1 = vld [vmem:[%s831_s1 + $0x4] sm:$0xf]  ;;  %v669_v2 = vld [vmem:[%s831_s1 + $0x8] sm:$0xf] }
   0x2   :  { %v674_v3 = vld [vmem:[%s831_s1 + $0xc] sm:$0xf]  ;;  %v679_v4 = vld [vmem:[%s831_s1 + $0x10] sm:$0xf]  ;;  %v684_v5 = vld [vmem:[%s831_s1 + $0x14] sm:$0xf] }
   0x3   :  { %v689_v6 = vld [vmem:[%s831_s1 + $0x18] sm:$0xf]  ;;  %v694_v7 = vld [vmem:[%s831_s1 + $0x1c] sm:$0xf]  ;;  %v704_v12 = vmov -inf   ;;  %v706_v13 = vmov -inf  }
   0x4   :  { %v708_v14 = vmov -inf   ;;  %v710_v15 = vmov -inf  }
   0x5 LB: > { %v401_v16 = vcombine.low %v659_v0, %v664_v1  ;;  %vm70_vm0 = vcmask 97280   ;;  %v403_v17 = vcombine.low %v679_v4, %v684_v5  ;;  %s412_s1 = sshll.u32 %s625_s5, 3  ;;  %vm83_vm1 = vcmask 1045504   ;;  %s627_s9 = smov 126   ;;  %s625_s5 = sphi %s712_s5, %s31_s5   ;;  %v621_v15 = vphi %v710_v15, %v842_v15   ;;  %v617_v14 = vphi %v708_v14, %v841_v14   ;;  %v613_v13 = vphi %v706_v13, %v840_v13   ;;  %v609_v12 = vphi %v704_v12, %v839_v12   ;;  %v605_v11 = vphi %v702_v11, %v838_v11   ;;  %v601_v10 = vphi %v700_v10, %v837_v10   ;;  %v597_v9 = vphi %v698_v9, %v836_v9   ;;  %v593_v8 = vphi %v696_v8, %v835_v8  }
   0x6   : > { %s42_s8 = scalar_lea.vmem %s830_s0, %s412_s1  ;;  %v402_v20 = vcombine.low %v669_v2, %v674_v3  ;;  %v404_v21 = vcombine.low %v689_v6, %v694_v7  ;;  %s628_s10 = smov 124  }
   0x7   : > { %430 = vmatprep.mubr.msk.bf16.mxu0 %vm70_vm0, %v401_v16  ;;  %434 = vmatprep.mubr.msk.bf16.mxu1 %vm70_vm0, %v403_v17  ;;  %v553_v18 = vld [vmem:[%s42_s8] sm:$0x3f]   ;;  %s629_s11 = smov 122   ;;  %s31_s5 = sadd.s32 1, %s625_s5  }
   0x8   : > { %475 = vmatprep.subr.msk.bf16.mxu0 %vm83_vm1, %v553_v18  ;;  %476 = vmatprep.subr.msk.bf16.mxu1 %vm83_vm1, %v553_v18  ;;  %v85_v19 = vsel %vm83_vm1, %v553_v18, 0  ;;  %p28_p0 = scmp.ge.s32.totalorder %s31_s5, 64  }
   0x9   : > { %429 = vmatpush3.bf16.msra.mxu0 %v85_v19  ;;  %474 = vmatpush3.bf16.msra.mxu1 %v85_v19  ;;  %vm278_vm2 = vcmask (%p28_p0), 523264   ;;  %v267_v0 = vld [vmem:[%s833_s3 + $0x8] sm:$0x3] (%p28_p0)  ;;  %vm362_vm3 = vcmask (%p28_p0), 9216   ;;  %vm360_vm4 = vcmask (%p28_p0), 15360  }
   0xa   :  { %v265_v2 = vld [vmem:[%s832_s2 + $0x8] sm:$0x3] (%p28_p0) }
   0xc   : > { %431 = vmatmul.mubr.msk.bf16.vlgmr.msra.gmra.mrb[0].mxu0 %vm70_vm0, %v402_v20  ;;  %435 = vmatmul.mubr.msk.bf16.vlgmr.msra.gmra.mrb[0].mxu1 %vm70_vm0, %v404_v21 }
  0xdf   : > { %v432_v22 = vpop.f32.mrb[0].mxu0  ;;  %v757_v23 = vpop.f32.mrb[0].mxu1 }
  0xe0   : > { %180 = vrot.lane.b32.xlu0 %v757_v23, %s627_s9  ;;  %v137_v24 = vpop.f32.mrb[1].mxu1  ;;  %172 = vrot.lane.b32.xlu1 %v432_v22, %s627_s9  ;;  %v121_v25 = vpop.f32.mrb[1].mxu0  ;;  %v154_v34 = vmax.f32 %v613_v13, %v432_v22 }
  0xe1   : > { %v433_v26 = vpop.f32.mrb[2].mxu0  ;;  %v762_v27 = vpop.f32.mrb[2].mxu1  ;;  %v152_v52 = vmax.f32 %v621_v15, %v121_v25  ;;  %v156_v56 = vmax.f32 %v605_v11, %v137_v24  ;;  %v158_v15 = vmax.f32 %v597_v9, %v757_v23 }
  0xe2   : > { %v764_v28 = vpop.f32.mrb[3].mxu0  ;;  %v140_v29 = vpop.f32.mrb[3].mxu1  ;;  %v155_v42 = vmax.f32 %v609_v12, %v433_v26  ;;  %v159_v18 = vmax.f32 %v593_v8, %v762_v27 }
  0xe3   : > { %v157_v62 = vmax.f32 %v601_v10, %v140_v29  ;;  %v153_v11 = vmax.f32 %v617_v14, %v764_v28 }
  0xe4   : > { %204 = vrot.lane.b32.xlu0 %v432_v22, %s628_s10  ;;  %174 = vrot.lane.b32.xlu1 %v433_v26, %s627_s9 }
  0xe8   : > { %212 = vrot.lane.b32.xlu0 %v757_v23, %s628_s10  ;;  %182 = vrot.lane.b32.xlu1 %v762_v27, %s627_s9 }
  0xec   : > { %236 = vrot.lane.b32.xlu0 %v432_v22, %s629_s11  ;;  %206 = vrot.lane.b32.xlu1 %v433_v26, %s628_s10 }
  0xf0   : > { %168 = vrot.lane.b32.xlu0 %v121_v25, %s627_s9  ;;  %214 = vrot.lane.b32.xlu1 %v762_v27, %s628_s10 }
  0xf4   : > { %176 = vrot.lane.b32.xlu0 %v137_v24, %s627_s9  ;;  %238 = vrot.lane.b32.xlu1 %v433_v26, %s629_s11 }
  0xf8   : > { %200 = vrot.lane.b32.xlu0 %v121_v25, %s628_s10  ;;  %178 = vrot.lane.b32.xlu1 %v140_v29, %s627_s9 }
  0xfc   : > { %208 = vrot.lane.b32.xlu0 %v137_v24, %s628_s10  ;;  %202 = vrot.lane.b32.xlu1 %v764_v28, %s628_s10 }
 0x100   : > { %232 = vrot.lane.b32.xlu0 %v121_v25, %s629_s11  ;;  %210 = vrot.lane.b32.xlu1 %v140_v29, %s628_s10 }
 0x104   : > { %240 = vrot.lane.b32.xlu0 %v137_v24, %s629_s11  ;;  %234 = vrot.lane.b32.xlu1 %v764_v28, %s629_s11 }
 0x108   : > { %242 = vrot.lane.b32.xlu1 %v140_v29, %s629_s11  ;;  %170 = vrot.lane.b32.xlu0 %v764_v28, %s627_s9 }
 0x10c   : > { %246 = vrot.lane.b32.xlu1 %v762_v27, %s629_s11  ;;  %244 = vrot.lane.b32.xlu0 %v757_v23, %s629_s11 }
 0x152   : > { %v181_v30 = vpop.permute.xlu0 %180  ;;  %v173_v31 = vpop.permute.xlu1 %172 }
 0x153   : > { %v194_v37 = vmax.f32 %v154_v34, %v173_v31  ;;  %v198_v22 = vmax.f32 %v158_v15, %v181_v30  ;;  %v264_v30 = vld [vmem:[%s832_s2] sm:$0xff] (%p28_p0) }
 0x154   :  { %454 = vmatprep.mubr.msk.f32.mxu0 (%p28_p0), %vm278_vm2, %v264_v30 }
 0x156   : > { %v205_v32 = vpop.permute.xlu0 %204  ;;  %v175_v33 = vpop.permute.xlu1 %174 }
 0x157   : > { %v226_v38 = vmax.f32 %v194_v37, %v205_v32  ;;  %v195_v45 = vmax.f32 %v155_v42, %v175_v33 }
 0x15a   : > { %v213_v35 = vpop.permute.xlu0 %212  ;;  %v183_v36 = vpop.permute.xlu1 %182 }
 0x15b   : > { %v199_v24 = vmax.f32 %v159_v18, %v183_v36  ;;  %v230_v26 = vmax.f32 %v198_v22, %v213_v35  ;;  %v266_v35 = vld [vmem:[%s833_s3] sm:$0xff] (%p28_p0)  ;;  %v630_v36 = vmov (%p28_p0), 0  }
 0x15c   :  { %554 = vset.pattern.permute.xlu0 (%p28_p0), %v630_v36 }
 0x15d   :  { %270 = vperm.xlu0 (%p28_p0), %554, %v266_v35  }
 0x15e   : > { %v237_v39 = vpop.permute.xlu0 %236  ;;  %v207_v40 = vpop.permute.xlu1 %206 }
 0x15f   : > { %v258_v41 = vmax.f32 %v226_v38, %v237_v39   ;;  %v227_v46 = vmax.f32 %v195_v45, %v207_v40 }
 0x161   :  { %275 = vperm.xlu0 (%p28_p0), %554, %v267_v0  }
 0x162   : > { %v169_v43 = vpop.permute.xlu0 %168  ;;  %v215_v44 = vpop.permute.xlu1 %214 }
 0x163   : > { %v192_v55 = vmax.f32 %v152_v52, %v169_v43  ;;  %v231_v29 = vmax.f32 %v199_v24, %v215_v44 }
 0x166   : > { %v177_v47 = vpop.permute.xlu0 %176  ;;  %v239_v48 = vpop.permute.xlu1 %238 }
 0x167   : > { %v259_v49 = vmax.f32 %v227_v46, %v239_v48   ;;  %v196_v60 = vmax.f32 %v156_v56, %v177_v47 }
 0x169   :  { %v461_v28 = vpack.c.bf16 (%p28_p0), %v259_v49, %v258_v41 }
 0x16a   : > { %v201_v50 = vpop.permute.xlu0 %200  ;;  %v179_v51 = vpop.permute.xlu1 %178 }
 0x16b   : > { %v224_v57 = vmax.f32 %v192_v55, %v201_v50  ;;  %v197_v16 = vmax.f32 %v157_v62, %v179_v51 }
 0x16e   : > { %v209_v53 = vpop.permute.xlu0 %208  ;;  %v203_v54 = vpop.permute.xlu1 %202 }
 0x16f   : > { %v228_v63 = vmax.f32 %v196_v60, %v209_v53 }
 0x172   : > { %v233_v58 = vpop.permute.xlu0 %232  ;;  %v211_v59 = vpop.permute.xlu1 %210 }
 0x173   : > { %v256_v61 = vmax.f32 %v224_v57, %v233_v58   ;;  %v229_v19 = vmax.f32 %v197_v16, %v211_v59 }
 0x175   : > { %v842_v15 = vmov %v256_v61 }
 0x176   : > { %v241_v12 = vpop.permute.xlu0 %240  ;;  %v235_v13 = vpop.permute.xlu1 %234 }
 0x177   : > { %v260_v17 = vmax.f32 %v228_v63, %v241_v12   ;;  %v839_v12 = vmov %v259_v49 }
 0x17a   : > { %v243_v20 = vpop.permute.xlu1 %242  ;;  %v171_v21 = vpop.permute.xlu0 %170 }
 0x17b   : > { %v261_v25 = vmax.f32 %v229_v19, %v243_v20   ;;  %v193_v10 = vmax.f32 %v153_v11, %v171_v21  ;;  %v838_v11 = vmov %v260_v17  ;;  %30 = sbr.rel (!%p28_p0) target bundleno = 5 (0x5), region = 44 }
 0x17d   : > { %v225_v31 = vmax.f32 %v193_v10, %v203_v54  ;;  %v837_v10 = vmov %v261_v25  ;;  %v465_v38 = vpack.c.bf16 (%p28_p0), %v261_v25, %v260_v17 }
 0x17e   : > { %v247_v32 = vpop.permute.xlu1 %246  ;;  %v245_v33 = vpop.permute.xlu0 %244 }
 0x17f   : > { %v257_v34 = vmax.f32 %v225_v31, %v235_v13   ;;  %v263_v23 = vmax.f32 %v231_v29, %v247_v32   ;;  %v262_v37 = vmax.f32 %v230_v26, %v245_v33   ;;  %v840_v13 = vmov %v258_v41 }
 0x181   : > { %v835_v8 = vmov %v263_v23  ;;  %v836_v9 = vmov %v262_v37  ;;  %v841_v14 = vmov %v257_v34  ;;  %v457_v27 = vpack.c.bf16 (%p28_p0), %v257_v34, %v256_v61 }
 0x182   :  { %v469_v1 = vpack.c.bf16 %v263_v23, %v262_v37 }
 0x183   :  { %458 = vmatprep.subr.bf16.mxu0 %v457_v27 }
 0x184   :  { %460 = vmatpush3.bf16.msra.mxu0 %v457_v27 }
 0x185   :  { %462 = vmatprep.subr.bf16.mxu0 %v461_v28 }
 0x188   :  { %464 = vmatpush3.bf16.msra.mxu0 %v461_v28 }
 0x189   :  { %466 = vmatprep.subr.bf16.mxu0 %v465_v38 }
 0x18c   :  { %468 = vmatpush3.bf16.msra.mxu0 %v465_v38 }
 0x18d   :  { %470 = vmatprep.subr.bf16.mxu0 %v469_v1 }
 0x190   :  { %472 = vmatpush3.bf16.msra.mxu0 %v469_v1 }
 0x193   :  { %455 = vmatmul.mubr.msk.f32.vlgmr.msra.gmra.mrb[0].mxu0 %vm278_vm2, %v265_v2 }
 0x1dc   :  { %v271_v3 = vpop.permute.xlu0 %270 }
 0x1e0   :  { %v276_v4 = vpop.permute.xlu0 %275 }
 0x266   :  { %v456_v5 = vpop.f32.mrb[0].mxu0 }
 0x267   :  { %v357_v6 = vadd.f32 %v456_v5, %v276_v4  ;;  %v351_v7 = vpop.f32.mrb[1].mxu0 }
 0x268   :  { %v352_v8 = vadd.f32 %v351_v7, %v271_v3 }
 0x269   :  { %363 = vst.msk [vmem:[%s834_s4 + $0x8] sm:$0x3] %vm362_vm3, %v357_v6 }
 0x26a   :  { %361 = vst.msk [vmem:[%s834_s4] sm:$0xff] %vm360_vm4, %v352_v8 }

</bundles_post_ra>
